<compile_context>
chip_gen: v7x
topology: tpu7x:2x2x1
jax: 0.10.0
libtpu: 0.0.40
codegen_flags: <defaults>
</compile_context>

<pallas_src>
import jax
import jax.numpy as jnp
from jax.experimental import pallas as pl
from jax.experimental.pallas import tpu as pltpu


def policy_kernel(x_ref, p_ref, b2d_ref, o_ref):
    # x_ref  : (TM, 4)   VMEM  batch tile of states
    # p_ref  : (8, 128)  VMEM  packed params: rows 0-3 = W1, row 4 = b1,
    #                          row 5 = w2[:,1]-w2[:,0], rows 6-7 = pad
    # b2d_ref: (1,)      SMEM  b2[1]-b2[0]
    # o_ref  : (TM, 2)   VMEM  [p(a=0), p(a=1)] per row
    x = x_ref[...]                                    # f32 from the wrapper

    w1 = p_ref[0:4, :]                                # (4, 128)
    b1 = p_ref[4:5, :]                                # (1, 128)

    # fc1 + ReLU (MXU matmul, f32 accumulate; VPU max)
    h = jnp.dot(x, w1, preferred_element_type=jnp.float32) + b1
    h = jnp.maximum(h, 0.0)                           # (TM, 128)

    # fc2 collapsed to the logit difference d = l1 - l0 (one VPU lane-mul +
    # one XLU lane-reduce; K=128, N=2 is too lane-sparse to be worth the MXU).
    d = jnp.sum(h * p_ref[5:6, :], axis=-1, keepdims=True) + b2d_ref[0]  # (TM, 1)

    # softmax over 2 logits == sigmoid(l1 - l0); exact divide keeps 1e-5 accuracy
    # and saturates cleanly (exp overflow -> p1 = 0, never NaN).
    p1 = 1.0 / (1.0 + jnp.exp(-d))                    # (TM, 1)
    p0 = 1.0 - p1

    o_ref[...] = jnp.concatenate([p0, p1], axis=-1)   # (TM, 2), single masked store


def pack_params(w1, b1, w2, b2):
    """Pack weights into one (8, 128) f32 slab + a (1,) scalar for SMEM.

    slab rows: 0-3 = W1 (4,128), 4 = b1, 5 = w2[:,1]-w2[:,0]; rows 6-7 pad.
    scalar   : b2[1]-b2[0].
    """
    slab = jnp.zeros((8, 128), jnp.float32)
    slab = slab.at[0:4, :].set(w1.astype(jnp.float32))
    slab = slab.at[4, :].set(b1.astype(jnp.float32))
    slab = slab.at[5, :].set((w2[:, 1] - w2[:, 0]).astype(jnp.float32))
    b2diff = (b2[1] - b2[0]).astype(jnp.float32).reshape(1)
    return slab, b2diff


def policy_forward(x, params_slab, b2diff, *, max_block_rows=1024):
    """x: (4,) or (B, 4) float32 -> (2,) or (B, 2) action probabilities."""
    single = x.ndim == 1
    x2 = (x.reshape(1, 4) if single else x).astype(jnp.float32)
    b = x2.shape[0]

    # Tile selection: as large as possible (amortize ~600-cycle per-step pipeline
    # overhead) while keeping >= 2 grid steps when B allows, so v7x megacore can
    # split the batch across both TensorCores.  Sublane (8) aligned.  With the
    # compact output, VMEM use is ~1.5 KB/row double-buffered, so tm=1024 stays
    # far below even v7x's 32 MiB default scoped VMEM limit.
    half = -(-b // 2)                                  # ceil(b / 2)
    tm = max(8, min(((half + 7) // 8) * 8, max_block_rows))
    grid = (pl.cdiv(b, tm),)                           # ragged edge handled by Pallas

    out = pl.pallas_call(
        policy_kernel,
        out_shape=jax.ShapeDtypeStruct((b, 2), jnp.float32),
        grid=grid,
        in_specs=[
            pl.BlockSpec((tm, 4), lambda i: (i, 0)),            # x batch tile
            pl.BlockSpec((8, 128), lambda i: (0, 0)),            # packed params (resident)
            pl.BlockSpec(memory_space=pltpu.MemorySpace.SMEM),   # b2diff scalar
        ],
        out_specs=pl.BlockSpec((tm, 2), lambda i: (i, 0)),       # compact output
        compiler_params=pltpu.CompilerParams(
            dimension_semantics=("parallel",)),                  # megacore on v7x
    )(x2, params_slab, b2diff)

    return out[0] if single else out


def init_params(key):
    """Deterministic init mimicking nn.Linear default (uniform +-1/sqrt(fan_in))."""
    k1, k2, k3, k4 = jax.random.split(key, 4)
    bound1 = 1.0 / jnp.sqrt(4.0)
    bound2 = 1.0 / jnp.sqrt(128.0)
    w1 = jax.random.uniform(k1, (4, 128), jnp.float32, -bound1, bound1)
    b1 = jax.random.uniform(k2, (128,), jnp.float32, -bound1, bound1)
    w2 = jax.random.uniform(k3, (128, 2), jnp.float32, -bound2, bound2)
    b2 = jax.random.uniform(k4, (2,), jnp.float32, -bound2, bound2)
    return w1, b1, w2, b2


# TODO(synk): train_net (Adam update + REINFORCE loss) and Categorical sampling are
# host-side training logic, not part of the forward pass, and are not implemented.

if __name__ == "__main__":
    key = jax.random.PRNGKey(0)
    kx, kp = jax.random.split(key)

    # Small batch of CartPole-like states, shape (B, 4)
    B = 8
    x = jax.random.normal(kx, (B, 4), jnp.float32)
    w1, b1, w2, b2 = init_params(kp)
    slab, b2d = pack_params(w1, b1, w2, b2)

    probs = policy_forward(x, slab, b2d)
    probs = jax.block_until_ready(probs)

    # Pure-JAX reference (same math as the PyTorch module, per state)
    h_ref = jnp.maximum(x @ w1 + b1, 0.0)
    logits_ref = h_ref @ w2 + b2
    ref = jax.nn.softmax(logits_ref, axis=-1)

    assert probs.shape == (B, 2)
    assert jnp.allclose(probs, ref, atol=1e-5), (probs, ref)
    assert jnp.allclose(jnp.sum(probs, axis=-1), 1.0, atol=1e-5)

    # Single-state path, matching the original module's forward((4,)) semantics
    p_single = jax.block_until_ready(policy_forward(x[0], slab, b2d))
    assert p_single.shape == (2,)
    assert jnp.allclose(p_single, ref[0], atol=1e-5), (p_single, ref[0])

    # A larger, non-tile-multiple batch to exercise the multi-step grid and the
    # ragged edge block (no host-side padding).
    B2 = 1000
    x_big = jax.random.normal(kx, (B2, 4), jnp.float32)
    probs_big = jax.block_until_ready(policy_forward(x_big, slab, b2d))
    h_big = jnp.maximum(x_big @ w1 + b1, 0.0)
    ref_big = jax.nn.softmax(h_big @ w2 + b2, axis=-1)
    assert probs_big.shape == (B2, 2)
    assert jnp.allclose(probs_big, ref_big, atol=1e-5)

    print("KERNEL_OK")
</pallas_src>

<mosaic_0001>
module attributes {stable_mosaic.version = 11 : i64} {
  func.func @policy_kernel(%arg0: i32, %arg1: memref<8x4xf32, #tpu.memory_space<vmem>>, %arg2: memref<8x128xf32, #tpu.memory_space<vmem>>, %arg3: memref<1xf32, #tpu.memory_space<smem>>, %arg4: memref<8x2xf32, #tpu.memory_space<vmem>>) attributes {dimension_semantics = [#tpu.dimension_semantics<parallel>], iteration_bounds = array<i64: 1>, scalar_prefetch = 0 : i64, scratch_operands = 0 : i64, tpu.core_type = #tpu.core_type<tc>, window_params = [{transform_indices = @transform_0, window_bounds = array<i64: 8, 4>}, {pipeline_mode = #tpu.pipeline_mode<synchronous>, transform_indices = @transform_1, window_bounds = array<i64: 8, 128>}, {transform_indices = @transform_2, window_bounds = array<i64: 1>}, {transform_indices = @transform_3, window_bounds = array<i64: 8, 2>}]} {
    %c0 = arith.constant 0 : index
    %c0_0 = arith.constant 0 : index
    %0 = vector.load %arg1[%c0, %c0_0] : memref<8x4xf32, #tpu.memory_space<vmem>>, vector<8x4xf32>
    %c0_1 = arith.constant 0 : index
    %c0_2 = arith.constant 0 : index
    %1 = vector.load %arg2[%c0_1, %c0_2] : memref<8x128xf32, #tpu.memory_space<vmem>>, vector<4x128xf32>
    %c4 = arith.constant 4 : index
    %c0_3 = arith.constant 0 : index
    %2 = vector.load %arg2[%c4, %c0_3] : memref<8x128xf32, #tpu.memory_space<vmem>>, vector<1x128xf32>
    %cst = arith.constant dense<0.000000e+00> : vector<8x128xf32>
    %3 = tpu.matmul %0, %1, %cst {dimension_numbers = #tpu.dot_dimension_numbers<[1], [0], [0], [1], [0, 0, 1, 1], [], []>} : vector<8x4xf32>, vector<4x128xf32>, vector<8x128xf32> -> vector<8x128xf32>
    %4 = vector.broadcast %2 : vector<1x128xf32> to vector<8x128xf32>
    %5 = arith.addf %3, %4 : vector<8x128xf32>
    %cst_4 = arith.constant 0.000000e+00 : f32
    %6 = vector.broadcast %cst_4 : f32 to vector<8x128xf32>
    %7 = arith.maximumf %5, %6 : vector<8x128xf32>
    %c5 = arith.constant 5 : index
    %c0_5 = arith.constant 0 : index
    %8 = vector.load %arg2[%c5, %c0_5] : memref<8x128xf32, #tpu.memory_space<vmem>>, vector<1x128xf32>
    %9 = vector.broadcast %8 : vector<1x128xf32> to vector<8x128xf32>
    %10 = arith.mulf %7, %9 : vector<8x128xf32>
    %cst_6 = arith.constant dense<0.000000e+00> : vector<8xf32>
    %11 = vector.multi_reduction <add>, %10, %cst_6 [1] : vector<8x128xf32> to vector<8xf32>
    %12 = vector.shape_cast %11 : vector<8xf32> to vector<8x1xf32>
    %c0_7 = arith.constant 0 : index
    %13 = memref.load %arg3[%c0_7] : memref<1xf32, #tpu.memory_space<smem>>
    %14 = vector.broadcast %13 : f32 to vector<8x1xf32>
    %15 = arith.addf %12, %14 : vector<8x1xf32>
    %cst_8 = arith.constant 0.000000e+00 : f32
    %16 = vector.broadcast %cst_8 : f32 to vector<8x1xf32>
    %17 = arith.subf %16, %15 : vector<8x1xf32>
    %18 = math.exp %17 : vector<8x1xf32>
    %cst_9 = arith.constant 1.000000e+00 : f32
    %19 = vector.broadcast %cst_9 : f32 to vector<8x1xf32>
    %20 = arith.addf %19, %18 : vector<8x1xf32>
    %cst_10 = arith.constant 1.000000e+00 : f32
    %21 = vector.broadcast %cst_10 : f32 to vector<8x1xf32>
    %22 = arith.divf %21, %20 : vector<8x1xf32>
    %cst_11 = arith.constant 1.000000e+00 : f32
    %23 = vector.broadcast %cst_11 : f32 to vector<8x1xf32>
    %24 = arith.subf %23, %22 : vector<8x1xf32>
    %25 = tpu.concatenate %24, %22 in 1 : vector<8x1xf32>, vector<8x1xf32> -> vector<8x2xf32>
    %c0_12 = arith.constant 0 : index
    %c0_13 = arith.constant 0 : index
    %26 = vector.load %arg4[%c0_12, %c0_13] : memref<8x2xf32, #tpu.memory_space<vmem>>, vector<8x2xf32>
    tpu.vector_store %arg4[%c0_12, %c0_13], %25 {strides = array<i32>} : memref<8x2xf32, #tpu.memory_space<vmem>>, vector<8x2xf32>,
    return
  }
  func.func @transform_0(%arg0: i32) -> (i32, i32) {
    %c0_i32 = arith.constant 0 : i32
    %c0_i32_0 = arith.constant 0 : i32
    return %arg0, %c0_i32 : i32, i32
  }
  func.func @transform_1(%arg0: i32) -> (i32, i32) {
    %c0_i32 = arith.constant 0 : i32
    %c0_i32_0 = arith.constant 0 : i32
    %c0_i32_1 = arith.constant 0 : i32
    return %c0_i32, %c0_i32_0 : i32, i32
  }
  func.func @transform_2(%arg0: i32) -> i32 {
    %c0_i32 = arith.constant 0 : i32
    %c0_i32_0 = arith.constant 0 : i32
    return %c0_i32 : i32
  }
  func.func @transform_3(%arg0: i32) -> (i32, i32) {
    %c0_i32 = arith.constant 0 : i32
    %c0_i32_0 = arith.constant 0 : i32
    return %arg0, %c0_i32 : i32, i32
  }
}

</mosaic_0001>

<bundles_post_ra>
// kernel: tpu_custom_call.1
= control target key start
LH: loop header
LB: loop body
LE: loop exit
PB: predicated region body
PF: predicated region fallthrough
CT: control target
= control target key end

     0   :  { %vm26_vm0 = vcmask 1043456   ;;  %vm22_vm1 = vcmask 31744   ;;  %v144_v0 = vmov 0.0   ;;  %vm145_vm2 = vmmov 0   ;;  %s184_s1 = inlined_call_operand.vmem [shape: f32[8,128], index: 1, kind: input, shape index: {}]   ;;  %s185_s0 = inlined_call_operand.vmem [shape: f32[8,4], index: 0, kind: input, shape index: {}]   ;;  %s186_s2 = inlined_call_operand.<no memory space> [shape: f32[1], index: 2, kind: input, shape index: {}]   ;;  %s187_s3 = inlined_call_operand.vmem [shape: f32[8,2], index: 3, kind: output, shape index: {}]  }
   0x1   :  { %133 = vmatprep.subr.mxu0 %v144_v0  ;;  %v16_v1 = vld [vmem:[%s184_s1] sm:$0xf]  ;;  %135 = vmatprep.mubr.msk.f32.mxu0 %vm145_vm2, %v144_v0  ;;  %v127_v3 = vld [vmem:[%s184_s1 + $0x4] ss:$0 sm:$0xff]  ;;  %v130_v7 = vld [vmem:[%s184_s1 + $0x5] ss:$0 sm:$0xff]  ;;  %v110_v10 = vstv %s186_s2 }
   0x2   :  { %v15_v2 = vld [vmem:[%s185_s0] sm:$0xff]  ;;  %134 = vmatpush3.msk.msra.mxu0 %vm26_vm0, %v16_v1  ;;  %vm119_vm3 = vcmask 7168   ;;  %vm121_vm4 = vcmask 15360  }
   0x3   :  { %136 = vmatmul.mubr.msk.f32.vlgmr.msra.gmra.mrb[0].mxu0 %vm22_vm1, %v15_v2 }
  0xd6   :  { %v96_v4 = vpop.f32.mrb[0].mxu0 }
  0xd7   :  { %v97_v5 = vadd.f32 %v127_v3, %v96_v4  ;;  %v137_v6 = vpop.f32.mrb[1].mxu0 }
  0xd9   :  { %v100_v8 = vmax.f32 %v97_v5, 0.0 }
  0xdb   :  { %v106_v9 = vmul.f32 %v130_v7, %v100_v8 }
  0xdd   :  { %107 = vadd.xlane.f32.xlu0 %v106_v9 }
 0x16a   :  { %v108_v11 = vpop.xlane.xlu0 %107 }
 0x16b   :  { %v111_v12 = vadd.f32 %v110_v10, %v108_v11 }
 0x16d   :  { %v112_v13 = vsub.f32 0.0, %v111_v12 }
 0x16f   :  { %v113_v14 = vmul.f32 1.442695, %v112_v13 }
 0x171   :  { %140 = vpow2.f32 %v113_v14 }
 0x17b   :  { %v141_v15 = vpop.eup %140 }
 0x17c   :  { %v115_v16 = vadd.f32 1.0, %v141_v15 }
 0x17e   :  { %142 = vrcp.f32 %v115_v16 }
 0x188   :  { %v143_v17 = vpop.eup %142 }
 0x189   :  { %v118_v18 = vsub.f32 1.0, %v143_v17 }
 0x18b   :  { %v120_v19 = vsel %vm119_vm3, %v118_v18, %v143_v17 }
 0x18c   :  { %122 = vst.msk [vmem:[%s187_s3] sm:$0xff] %vm121_vm4, %v120_v19 }

</bundles_post_ra>
